<compile_context>
chip_gen: v7x
topology: tpu7x:2x2x1
jax: 0.10.0
libtpu: 0.0.40
codegen_flags: <defaults>
</compile_context>

<pallas_src>
import jax
import jax.numpy as jnp
from jax.experimental import pallas as pl
from jax.experimental.pallas import tpu as pltpu


# ----------------------------------------------------------------------------
# Kernels (specialized on the real/fake label at trace time).
# ----------------------------------------------------------------------------
def _lsgan_real_kernel(x_ref, o_ref):
    # loss = (x - 1)^2; math in f32 registers, store in the input dtype.
    x = x_ref[...].astype(jnp.float32)
    d = x - 1.0
    o_ref[...] = (d * d).astype(o_ref.dtype)


def _lsgan_fake_kernel(x_ref, o_ref):
    # loss = (x - 0)^2 = x * x
    x = x_ref[...].astype(jnp.float32)
    o_ref[...] = (x * x).astype(o_ref.dtype)


# ----------------------------------------------------------------------------
# Tiling helpers.
# ----------------------------------------------------------------------------
def _sublane_align(itemsize: int) -> int:
    # Sublane packing per dtype width: f32 -> 8, bf16 -> 16, int8/fp8 -> 32.
    return {4: 8, 2: 16, 1: 32}.get(itemsize, 8)


def _pick_cols(n: int, align: int):
    """Widest lane-dense column count that needs no padding, or None."""
    for cols in (1024, 512, 256, 128):
        if n % cols == 0 and (n // cols) % align == 0:
            return cols
    return None


def _choose_tile_rows(rows: int, cols: int, itemsize: int, align: int) -> int:
    """Pick the block row count for a (rows, cols) lane-dense slab."""
    # ~2 MiB per input tile; in+out double-buffered => ~8 MiB VMEM, well under
    # the default scoped-VMEM limit on v5e/v6e/v7x.
    target = (2 << 20) // (cols * itemsize)
    tm = max(align, (target // align) * align)
    tm = min(tm, rows)
    tm = max(align, (tm // align) * align)
    # Keep >= ~8 grid steps on big inputs (feeds both v7x TensorCores and gives
    # the DMA pipeline depth) but never shrink tiles below ~256 KiB.
    while (pl.cdiv(rows, tm) < 8 and tm > align
           and tm * cols * itemsize > (256 << 10)):
        tm = max(align, ((tm // 2) // align) * align)
    return tm


def _run_pallas(slab: jax.Array, target_is_real: bool) -> jax.Array:
    rows, cols = slab.shape
    itemsize = slab.dtype.itemsize
    align = _sublane_align(itemsize)
    tm = _choose_tile_rows(rows, cols, itemsize, align)
    grid = (pl.cdiv(rows, tm),)  # ragged last block handled by Pallas
    kernel = _lsgan_real_kernel if target_is_real else _lsgan_fake_kernel
    return pl.pallas_call(
        kernel,
        out_shape=jax.ShapeDtypeStruct((rows, cols), slab.dtype),
        grid=grid,
        in_specs=[pl.BlockSpec((tm, cols), lambda i: (i, 0))],
        out_specs=pl.BlockSpec((tm, cols), lambda i: (i, 0)),
        compiler_params=pltpu.CompilerParams(
            dimension_semantics=("parallel",)),
    )(slab)


# ----------------------------------------------------------------------------
# Public entry point (== LSGAN.forward).
# ----------------------------------------------------------------------------
def lsgan_loss(prediction: jax.Array, target_is_real: bool,
               *, min_pallas_numel: int = 1 << 16) -> jax.Array:
    """Elementwise LSGAN loss; returns an array with prediction's shape/dtype."""
    prediction = jnp.asarray(prediction)
    n = prediction.size
    target = 1.0 if target_is_real else 0.0

    # Small predictions: launch + reshape overhead dominates; let XLA fuse the
    # elementwise op into the surrounding graph.
    if n == 0 or n < min_pallas_numel:
        d = prediction - jnp.asarray(target, dtype=prediction.dtype)
        return d * d

    orig_shape = prediction.shape
    align = _sublane_align(prediction.dtype.itemsize)

    # Fast path: pad-free lane-dense slab (reshape of a contiguous array is a
    # layout bitcast, no extra HBM pass).
    cols = _pick_cols(n, align)
    if cols is not None:
        slab = prediction.reshape(n // cols, cols)
        return _run_pallas(slab, target_is_real).reshape(orig_shape)

    # General path: pad the flat view up to an (align, 128)-aligned slab, run
    # the kernel, slice the valid prefix back out.
    cols = 128
    flat = prediction.reshape(-1)
    rows = -(-n // cols)
    rows_padded = -(-rows // align) * align
    slab = jnp.pad(flat, (0, rows_padded * cols - n)).reshape(rows_padded, cols)
    out = _run_pallas(slab, target_is_real)
    return out.reshape(-1)[:n].reshape(orig_shape)


# ----------------------------------------------------------------------------
# Self-test.
# ----------------------------------------------------------------------------
if __name__ == "__main__":
    key = jax.random.PRNGKey(0)
    k1, k2, k3 = jax.random.split(key, 3)

    # Discriminator-style NCHW outputs (small shapes).
    x_small = jax.random.normal(k1, (2, 4, 16, 16), dtype=jnp.float32)
    x_large = jax.random.normal(k2, (4, 8, 64, 64), dtype=jnp.float32)
    x_bf16 = jax.random.normal(k3, (4, 8, 64, 64),
                               dtype=jnp.float32).astype(jnp.bfloat16)
    x_ragged = jax.random.normal(k1, (3, 5, 7, 11), dtype=jnp.float32)

    # 1) Small input forced through the Pallas kernel (pad-free path), fake label.
    out_f_small = lsgan_loss(x_small, False, min_pallas_numel=0)
    jax.block_until_ready(out_f_small)
    assert out_f_small.shape == x_small.shape
    assert out_f_small.dtype == x_small.dtype
    assert jnp.allclose(out_f_small, x_small ** 2, atol=1e-6)

    # 2) Same input, default small-size bypass (pure jnp), real label.
    out_r_small = lsgan_loss(x_small, True)
    jax.block_until_ready(out_r_small)
    assert jnp.allclose(out_r_small, (x_small - 1.0) ** 2, atol=1e-6)

    # 3) Larger f32 input through the Pallas path, real and fake labels.
    out_r = lsgan_loss(x_large, True, min_pallas_numel=0)
    out_f = lsgan_loss(x_large, False, min_pallas_numel=0)
    jax.block_until_ready(out_r)
    jax.block_until_ready(out_f)
    assert out_r.shape == x_large.shape and out_r.dtype == x_large.dtype
    assert jnp.allclose(out_r, (x_large - 1.0) ** 2, atol=1e-6)
    assert jnp.allclose(out_f, x_large ** 2, atol=1e-6)

    # 4) bf16 stays bf16 end-to-end; math done in f32 inside the kernel.
    out_b = lsgan_loss(x_bf16, True, min_pallas_numel=0)
    jax.block_until_ready(out_b)
    assert out_b.dtype == jnp.bfloat16
    ref_b = ((x_bf16.astype(jnp.float32) - 1.0) ** 2).astype(jnp.bfloat16)
    assert jnp.allclose(out_b.astype(jnp.float32), ref_b.astype(jnp.float32),
                        atol=1e-2, rtol=1e-2)

    # 5) Awkward numel (not a multiple of 1024): exercises the pad/slice path.
    out_g = lsgan_loss(x_ragged, True, min_pallas_numel=0)
    jax.block_until_ready(out_g)
    assert out_g.shape == x_ragged.shape
    assert jnp.allclose(out_g, (x_ragged - 1.0) ** 2, atol=1e-6)

    print("KERNEL_OK")
</pallas_src>

<mosaic_0001>
module attributes {stable_mosaic.version = 11 : i64} {
  func.func @_lsgan_fake_kernel(%arg0: i32, %arg1: memref<8x256xf32, #tpu.memory_space<vmem>>, %arg2: memref<8x256xf32, #tpu.memory_space<vmem>>) attributes {dimension_semantics = [#tpu.dimension_semantics<parallel>], iteration_bounds = array<i64: 1>, scalar_prefetch = 0 : i64, scratch_operands = 0 : i64, tpu.core_type = #tpu.core_type<tc>, window_params = [{transform_indices = @transform_0, window_bounds = array<i64: 8, 256>}, {transform_indices = @transform_1, window_bounds = array<i64: 8, 256>}]} {
    %c0 = arith.constant 0 : index
    %c0_0 = arith.constant 0 : index
    %0 = vector.load %arg1[%c0, %c0_0] : memref<8x256xf32, #tpu.memory_space<vmem>>, vector<8x256xf32>
    %1 = arith.mulf %0, %0 : vector<8x256xf32>
    %c0_1 = arith.constant 0 : index
    %c0_2 = arith.constant 0 : index
    %2 = vector.load %arg2[%c0_1, %c0_2] : memref<8x256xf32, #tpu.memory_space<vmem>>, vector<8x256xf32>
    tpu.vector_store %arg2[%c0_1, %c0_2], %1 {strides = array<i32>} : memref<8x256xf32, #tpu.memory_space<vmem>>, vector<8x256xf32>,
    return
  }
  func.func @transform_0(%arg0: i32) -> (i32, i32) {
    %c0_i32 = arith.constant 0 : i32
    %c0_i32_0 = arith.constant 0 : i32
    return %arg0, %c0_i32 : i32, i32
  }
  func.func @transform_1(%arg0: i32) -> (i32, i32) {
    %c0_i32 = arith.constant 0 : i32
    %c0_i32_0 = arith.constant 0 : i32
    return %arg0, %c0_i32 : i32, i32
  }
}

</mosaic_0001>

<bundles_post_ra>
// kernel: tpu_custom_call.1
= control target key start
LH: loop header
LB: loop body
LE: loop exit
PB: predicated region body
PF: predicated region fallthrough
CT: control target
= control target key end

     0   :  { %6 = vsyncpa [#allocation3], 0  ;;  %s128_s0 = inlined_call_operand.hbm [shape: f32[8,256], index: 0, kind: input, shape index: {}]   ;;  %s129_s1 = inlined_call_operand.hbm [shape: f32[8,256], index: 1, kind: output, shape index: {}]  }
   0x1   :  { %7 = vsyncpa [#allocation4], 0  ;;  %s92_s6 = smov [#allocation2]   ;;  %s44_s10 = scalar_lea.hbm %s128_s0, 256 }
   0x2   :  { %s14_s7 = sshll.u32 %s92_s6, 4  ;;  %p45_p0 = scmp.ne.s32.totalorder %s128_s0, %s44_s10  ;;  %s15_s7 = int_to_ptr.vmem [resolvable:$true] %s14_s7 }
   0x3   :  { %p48_p1 = scmp.lt.u32.totalorder %s44_s10, %s128_s0 }
   0x5   :  { %p50_p2 = pnand %p48_p1, %p45_p0 }
   0x7   :  { %53 = shalt.err (!%p50_p2)
}
   0x8   :  { %s54_s15 = scalar_lea.vmem %s15_s7, 256  ;;  %p59_p4 = scmp.lt.s32.totalorder %s15_s7, %s15_s7 }
   0x9   :  { %p55_p3 = scmp.ne.s32.totalorder %s15_s7, %s54_s15  ;;  %p60_p5 = scmp.lt.s32.totalorder %s54_s15, %s54_s15 }
   0xb   :  { %p61_p6 = por %p60_p5, %p59_p4 }
   0xd   :  { %p62_p7 = pnand %p61_p6, %p55_p3 }
   0xf   :  { %65 = shalt.err (!%p62_p7)
}
  0x10   :  { %17 = dma.hbm_to_vmem [thread:$0]  %s128_s0, 256, %s15_s7, [#allocation3]  }
  0x11   :  { %88 = dma.done.wait [#allocation3], 256  }
  0x12   :  { %89 = vsyncadd [#allocation3], 4294967040  ;;  %s93_s18 = smov [#allocation5]   ;;  %v21_v0 = vld [vmem:[#allocation2] sm:$0xff]  ;;  %v22_v1 = vld [vmem:[#allocation2 + $0x8] sm:$0xff] }
  0x13   :  { %s33_s19 = sshll.u32 %s93_s18, 4  ;;  %v23_v2 = vmul.f32 %v21_v0, %v21_v0  ;;  %v24_v3 = vmul.f32 %v22_v1, %v22_v1  ;;  %s34_s19 = int_to_ptr.vmem [resolvable:$true] %s33_s19 }
  0x14   :  { %s66_s20 = scalar_lea.vmem %s34_s19, 256  ;;  %p71_p9 = scmp.lt.s32.totalorder %s34_s19, %s34_s19 }
  0x15   :  { %25 = vst [vmem:[#allocation5] sm:$0xff] %v23_v2  ;;  %26 = vst [vmem:[#allocation5 + $0x8] sm:$0xff] %v24_v3  ;;  %p67_p8 = scmp.ne.s32.totalorder %s34_s19, %s66_s20  ;;  %p72_p10 = scmp.lt.s32.totalorder %s66_s20, %s66_s20 }
  0x17   :  { %p73_p11 = por %p72_p10, %p71_p9 }
  0x19   :  { %p74_p12 = pnand %p73_p11, %p67_p8 }
  0x1b   :  { %77 = shalt.err (!%p74_p12)
}
  0x1c   :  { %s78_s22 = scalar_lea.hbm %s129_s1, 256 }
  0x1d   :  { %p79_p13 = scmp.ne.s32.totalorder %s129_s1, %s78_s22  ;;  %p82_p0 = scmp.lt.u32.totalorder %s78_s22, %s129_s1 }
  0x1f   :  { %p84_p1 = pnand %p82_p0, %p79_p13 }
  0x21   :  { %87 = shalt.err (!%p84_p1)
}
  0x22   :  { %36 = dma.vmem_to_hbm [thread:$0]  %s34_s19, 256, %s129_s1, [#allocation4]  }
  0x23   :  { %90 = dma.done.wait [#allocation4], 256  }
  0x24   :  { %91 = vsyncadd [#allocation4], 4294967040 }
  0x25   :  { %40 = vsyncpa [#allocation3], 1 }
  0x26   :  { %41 = vsyncpa [#allocation4], 1 }

</bundles_post_ra>
